<compile_context>
chip_gen: v7x
topology: tpu7x:2x2x1
jax: 0.10.0
libtpu: 0.0.40
codegen_flags: <defaults>
</compile_context>

<pallas_src>
import jax
import jax.numpy as jnp
from jax.experimental import pallas as pl
from jax.experimental.pallas import tpu as pltpu


def _kl_masked_kernel(blk_cnt_ref, pred_ref, tgt_ref, mask_ref, out_ref):
    """One row-block: emit a lane-dense (8,128) tile holding this block's masked KL sum."""
    i = pl.program_id(0)

    @pl.when(blk_cnt_ref[i] == 0)
    def _():
        # No masked rows in this block: contribute zero, skip all transcendental work.
        out_ref[...] = jnp.zeros_like(out_ref)

    @pl.when(blk_cnt_ref[i] > 0)
    def _():
        pred = pred_ref[...].astype(jnp.float32)   # (R, V)
        tgt = tgt_ref[...].astype(jnp.float32)     # (R, V)
        mask = mask_ref[...]                       # (R, 1) float32, 1.0 where label == 1

        # Row-wise log-sum-exp pieces of log_softmax (never materialize logp per element).
        m = jnp.max(pred, axis=-1, keepdims=True)                        # (R, 1)
        z = pred - m                                                     # (R, V)
        lse = jnp.log(jnp.sum(jnp.exp(z), axis=-1, keepdims=True))       # (R, 1)

        # Row reductions over V (XLU) before any masking.
        t_sum = jnp.sum(tgt, axis=-1, keepdims=True)                     # (R, 1)
        t_z_sum = jnp.sum(tgt * z, axis=-1, keepdims=True)               # (R, 1)
        safe_t = jnp.where(tgt > 0, tgt, 1.0)
        t_logt_sum = jnp.sum(jnp.where(tgt > 0, tgt * jnp.log(safe_t), 0.0),
                             axis=-1, keepdims=True)                     # (R, 1)

        # sum_v t*log_softmax(pred) = t_z_sum - lse * t_sum
        row_kl = t_logt_sum - t_z_sum + lse * t_sum                      # (R, 1)

        block_sum = jnp.sum(row_kl * mask)                               # scalar
        # Lane-dense, unmasked full-tile store; wrapper reads element [0, 0] per block.
        out_ref[...] = jnp.broadcast_to(block_sum, out_ref.shape)


def _round_up(x, m):
    return ((x + m - 1) // m) * m


_INPUT_VMEM_BUDGET_BYTES = 24 * 1024 * 1024  # pred + tgt, f32, double-buffered


def _choose_rows_block(num_rows, vocab):
    bytes_per_row = vocab * 4 * 2 * 2  # 2 inputs x 2 pipeline buffers, f32
    rows = _INPUT_VMEM_BUDGET_BYTES // max(bytes_per_row, 1)
    rows = max(8, min(int(rows), 2048))       # big enough to amortize per-step overhead
    rows = (rows // 8) * 8                    # sublane alignment
    rows = min(rows, _round_up(num_rows, 8))  # don't exceed (padded) problem size
    return max(rows, 8)


def kl_masked_loss(prediction_scores_a, audio_target, audio_labels):
    """prediction_scores_a, audio_target: (B, T, V) float; audio_labels: (B, T) int."""
    B, T, V = prediction_scores_a.shape
    num_rows = B * T

    pred = prediction_scores_a.reshape(num_rows, V)
    tgt = audio_target.reshape(num_rows, V)
    lbl = audio_labels.reshape(num_rows).astype(jnp.int32)

    rows_block = _choose_rows_block(num_rows, V)
    padded_rows = _round_up(num_rows, rows_block)
    pad = padded_rows - num_rows
    if pad:
        # Padding rows: pred=0 / tgt=0 / label=0 -> contribute exactly 0 (mask is 0).
        pred = jnp.pad(pred, ((0, pad), (0, 0)))
        tgt = jnp.pad(tgt, ((0, pad), (0, 0)))
        lbl = jnp.pad(lbl, ((0, pad),))

    num_blocks = padded_rows // rows_block

    # Tiny wrapper-side ops: per-row mask, per-block masked-row counts, global count.
    mask = (lbl == 1).astype(jnp.float32).reshape(padded_rows, 1)
    blk_counts = jnp.sum(mask.reshape(num_blocks, rows_block), axis=1).astype(jnp.int32)
    count = jnp.sum((audio_labels == 1).astype(jnp.float32))

    grid_spec = pltpu.PrefetchScalarGridSpec(
        num_scalar_prefetch=1,
        grid=(num_blocks,),
        in_specs=[
            pl.BlockSpec((rows_block, V), lambda i, bc: (i, 0)),
            pl.BlockSpec((rows_block, V), lambda i, bc: (i, 0)),
            pl.BlockSpec((rows_block, 1), lambda i, bc: (i, 0)),
        ],
        out_specs=pl.BlockSpec((8, 128), lambda i, bc: (i, 0)),
    )

    partial_tiles = pl.pallas_call(
        _kl_masked_kernel,
        out_shape=jax.ShapeDtypeStruct((num_blocks * 8, 128), jnp.float32),
        grid_spec=grid_spec,
        compiler_params=pltpu.CompilerParams(
            dimension_semantics=("parallel",),
            vmem_limit_bytes=40 * 1024 * 1024,
        ),
    )(blk_counts, pred, tgt, mask)

    partials = partial_tiles.reshape(num_blocks, 8, 128)[:, 0, 0]  # one scalar per block
    masked_sum = jnp.sum(partials)

    # PyTorch: / max(sum(labels == 1), 0) — no clamp to 1, so count == 0 gives NaN (kept).
    return masked_sum / jnp.maximum(count, 0.0)


def _reference(pred, tgt, lbl):
    logp = jax.nn.log_softmax(pred, axis=2)
    safe_t = jnp.where(tgt > 0, tgt, 1.0)
    kl = jnp.where(tgt > 0, tgt * jnp.log(safe_t), 0.0) - tgt * logp
    mask = (lbl == 1).astype(jnp.float32)[:, :, None]
    return jnp.sum(kl * mask) / jnp.maximum(jnp.sum(mask), 0.0)


if __name__ == "__main__":
    B, T, V = 2, 8, 128
    key = jax.random.PRNGKey(0)
    k1, k2, k3 = jax.random.split(key, 3)

    prediction_scores_a = jax.random.normal(k1, (B, T, V), dtype=jnp.float32)
    # audio_target is a probability distribution over V (KLDivLoss target).
    audio_target = jax.nn.softmax(
        jax.random.normal(k2, (B, T, V), dtype=jnp.float32), axis=2)
    audio_labels = jax.random.randint(k3, (B, T), 0, 2, dtype=jnp.int32)

    loss_fn = jax.jit(kl_masked_loss)
    loss = loss_fn(prediction_scores_a, audio_target, audio_labels)
    jax.block_until_ready(loss)

    ref = _reference(prediction_scores_a, audio_target, audio_labels)
    assert jnp.allclose(loss, ref, rtol=1e-5, atol=1e-5), (loss, ref)

    print("KERNEL_OK")
</pallas_src>

<mosaic_0001>
module attributes {stable_mosaic.version = 11 : i64} {
  func.func @_kl_masked_kernel(%arg0: i32, %arg1: memref<1xi32, #tpu.memory_space<smem>>, %arg2: memref<16x128xf32, #tpu.memory_space<vmem>>, %arg3: memref<16x128xf32, #tpu.memory_space<vmem>>, %arg4: memref<16x1xf32, #tpu.memory_space<vmem>>, %arg5: memref<8x128xf32, #tpu.memory_space<vmem>>) attributes {dimension_semantics = [#tpu.dimension_semantics<parallel>], iteration_bounds = array<i64: 1>, scalar_prefetch = 1 : i64, scratch_operands = 0 : i64, tpu.core_type = #tpu.core_type<tc>, window_params = [{transform_indices = @transform_0, window_bounds = array<i64: 16, 128>}, {transform_indices = @transform_1, window_bounds = array<i64: 16, 128>}, {transform_indices = @transform_2, window_bounds = array<i64: 16, 1>}, {transform_indices = @transform_3, window_bounds = array<i64: 8, 128>}]} {
    %0 = arith.index_cast %arg0 : i32 to index
    %1 = memref.load %arg1[%0] : memref<1xi32, #tpu.memory_space<smem>>
    %c0_i32 = arith.constant 0 : i32
    %2 = arith.cmpi eq, %1, %c0_i32 : i32
    %3 = arith.extui %2 : i1 to i32
    %c0_i32_0 = arith.constant 0 : i32
    %4 = arith.cmpi ne, %3, %c0_i32_0 : i32
    scf.if %4 {
      %cst = arith.constant 0.000000e+00 : f32
      %10 = vector.broadcast %cst : f32 to vector<8x128xf32>
      %c0 = arith.constant 0 : index
      %c0_3 = arith.constant 0 : index
      %11 = vector.load %arg5[%c0, %c0_3] : memref<8x128xf32, #tpu.memory_space<vmem>>, vector<8x128xf32>
      tpu.vector_store %arg5[%c0, %c0_3], %10 {strides = array<i32>} : memref<8x128xf32, #tpu.memory_space<vmem>>, vector<8x128xf32>,
    } else {
    }
    %5 = arith.index_cast %arg0 : i32 to index
    %6 = memref.load %arg1[%5] : memref<1xi32, #tpu.memory_space<smem>>
    %c0_i32_1 = arith.constant 0 : i32
    %7 = arith.cmpi sgt, %6, %c0_i32_1 : i32
    %8 = arith.extui %7 : i1 to i32
    %c0_i32_2 = arith.constant 0 : i32
    %9 = arith.cmpi ne, %8, %c0_i32_2 : i32
    scf.if %9 {
      %c0 = arith.constant 0 : index
      %c0_3 = arith.constant 0 : index
      %10 = vector.load %arg2[%c0, %c0_3] : memref<16x128xf32, #tpu.memory_space<vmem>>, vector<16x128xf32>
      %c0_4 = arith.constant 0 : index
      %c0_5 = arith.constant 0 : index
      %11 = vector.load %arg3[%c0_4, %c0_5] : memref<16x128xf32, #tpu.memory_space<vmem>>, vector<16x128xf32>
      %c0_6 = arith.constant 0 : index
      %c0_7 = arith.constant 0 : index
      %12 = vector.load %arg4[%c0_6, %c0_7] : memref<16x1xf32, #tpu.memory_space<vmem>>, vector<16x1xf32>
      %cst = arith.constant dense<0xFF800000> : vector<16xf32>
      %13 = vector.multi_reduction <maximumf>, %10, %cst [1] : vector<16x128xf32> to vector<16xf32>
      %14 = vector.shape_cast %13 : vector<16xf32> to vector<16x1xf32>
      %15 = vector.broadcast %14 : vector<16x1xf32> to vector<16x128xf32>
      %16 = arith.subf %10, %15 : vector<16x128xf32>
      %17 = math.exp %16 : vector<16x128xf32>
      %cst_8 = arith.constant dense<0.000000e+00> : vector<16xf32>
      %18 = vector.multi_reduction <add>, %17, %cst_8 [1] : vector<16x128xf32> to vector<16xf32>
      %19 = vector.shape_cast %18 : vector<16xf32> to vector<16x1xf32>
      %20 = math.log %19 : vector<16x1xf32>
      %cst_9 = arith.constant dense<0.000000e+00> : vector<16xf32>
      %21 = vector.multi_reduction <add>, %11, %cst_9 [1] : vector<16x128xf32> to vector<16xf32>
      %22 = vector.shape_cast %21 : vector<16xf32> to vector<16x1xf32>
      %23 = arith.mulf %11, %16 : vector<16x128xf32>
      %cst_10 = arith.constant dense<0.000000e+00> : vector<16xf32>
      %24 = vector.multi_reduction <add>, %23, %cst_10 [1] : vector<16x128xf32> to vector<16xf32>
      %25 = vector.shape_cast %24 : vector<16xf32> to vector<16x1xf32>
      %cst_11 = arith.constant 0.000000e+00 : f32
      %26 = vector.broadcast %cst_11 : f32 to vector<16x128xf32>
      %27 = arith.cmpf ogt, %11, %26 : vector<16x128xf32>
      %cst_12 = arith.constant 1.000000e+00 : f32
      %28 = vector.broadcast %cst_12 : f32 to vector<16x128xf32>
      %29 = arith.select %27, %11, %28 : vector<16x128xi1>, vector<16x128xf32>
      %cst_13 = arith.constant 0.000000e+00 : f32
      %30 = vector.broadcast %cst_13 : f32 to vector<16x128xf32>
      %31 = arith.cmpf ogt, %11, %30 : vector<16x128xf32>
      %32 = math.log %29 : vector<16x128xf32>
      %33 = arith.mulf %11, %32 : vector<16x128xf32>
      %cst_14 = arith.constant 0.000000e+00 : f32
      %34 = vector.broadcast %cst_14 : f32 to vector<16x128xf32>
      %35 = arith.select %31, %33, %34 : vector<16x128xi1>, vector<16x128xf32>
      %cst_15 = arith.constant dense<0.000000e+00> : vector<16xf32>
      %36 = vector.multi_reduction <add>, %35, %cst_15 [1] : vector<16x128xf32> to vector<16xf32>
      %37 = vector.shape_cast %36 : vector<16xf32> to vector<16x1xf32>
      %38 = arith.subf %37, %25 : vector<16x1xf32>
      %39 = arith.mulf %20, %22 : vector<16x1xf32>
      %40 = arith.addf %38, %39 : vector<16x1xf32>
      %41 = arith.mulf %40, %12 : vector<16x1xf32>
      %42 = vector.shape_cast %41 : vector<16x1xf32> to vector<1x16x1xf32>
      %cst_16 = arith.constant dense<0.000000e+00> : vector<1xf32>
      %43 = vector.multi_reduction <add>, %42, %cst_16 [1, 2] : vector<1x16x1xf32> to vector<1xf32>
      %44 = vector.shape_cast %43 : vector<1xf32> to vector<1x1x1xf32>
      %45 = vector.extract %44[0, 0, 0] : f32 from vector<1x1x1xf32>
      %46 = vector.broadcast %45 : f32 to vector<8x128xf32>
      %c0_17 = arith.constant 0 : index
      %c0_18 = arith.constant 0 : index
      %47 = vector.load %arg5[%c0_17, %c0_18] : memref<8x128xf32, #tpu.memory_space<vmem>>, vector<8x128xf32>
      tpu.vector_store %arg5[%c0_17, %c0_18], %46 {strides = array<i32>} : memref<8x128xf32, #tpu.memory_space<vmem>>, vector<8x128xf32>,
    } else {
    }
    return
  }
  func.func @transform_0(%arg0: i32, %arg1: memref<1xi32, #tpu.memory_space<smem>>) -> (i32, i32) {
    %c0_i32 = arith.constant 0 : i32
    %c0_i32_0 = arith.constant 0 : i32
    return %arg0, %c0_i32 : i32, i32
  }
  func.func @transform_1(%arg0: i32, %arg1: memref<1xi32, #tpu.memory_space<smem>>) -> (i32, i32) {
    %c0_i32 = arith.constant 0 : i32
    %c0_i32_0 = arith.constant 0 : i32
    return %arg0, %c0_i32 : i32, i32
  }
  func.func @transform_2(%arg0: i32, %arg1: memref<1xi32, #tpu.memory_space<smem>>) -> (i32, i32) {
    %c0_i32 = arith.constant 0 : i32
    %c0_i32_0 = arith.constant 0 : i32
    return %arg0, %c0_i32 : i32, i32
  }
  func.func @transform_3(%arg0: i32, %arg1: memref<1xi32, #tpu.memory_space<smem>>) -> (i32, i32) {
    %c0_i32 = arith.constant 0 : i32
    %c0_i32_0 = arith.constant 0 : i32
    return %arg0, %c0_i32 : i32, i32
  }
}

</mosaic_0001>

<bundles_post_ra>
// kernel: kl_masked_loss.1
= control target key start
LH: loop header
LB: loop body
LE: loop exit
PB: predicated region body
PF: predicated region fallthrough
CT: control target
= control target key end

     0   :  { %s181_s0 = inlined_call_operand.<no memory space> [shape: s32[1], index: 0, kind: input, shape index: {}]   ;;  %s182_s1 = inlined_call_operand.vmem [shape: f32[16,128], index: 1, kind: input, shape index: {}]   ;;  %s183_s2 = inlined_call_operand.vmem [shape: f32[16,128], index: 2, kind: input, shape index: {}]   ;;  %s184_s3 = inlined_call_operand.vmem [shape: f32[16,1], index: 3, kind: input, shape index: {}]   ;;  %s185_s4 = inlined_call_operand.vmem [shape: f32[8,128], index: 4, kind: output, shape index: {}]  }
   0x1   :  { %9 = sst [smem:[#allocation3]] %s181_s0  ;;  %p104_p0 = scmp.ne.s32.totalorder %s181_s0, 0 }
   0x2   :  { %v121_v0 = vmov (!%p104_p0), 0.0  }
   0x3   :  { %20 = sbr.rel (%p104_p0) target bundleno = 10 (0xa), region = 17  ;;  %21 = vst [vmem:[%s185_s4] sm:$0xff] (!%p104_p0), %v121_v0 }
   0xa PF:  { %s22_s21 = sld [smem:[#allocation3]] }
  0x10   :  { %p105_p1 = scmp.le.s32.totalorder %s22_s21, 0 }
  0x11   :  { %v27_v1 = vld [vmem:[%s182_s1] sm:$0xff] (!%p105_p1)  ;;  %v28_v2 = vld [vmem:[%s182_s1 + $0x8] sm:$0xff] (!%p105_p1)  ;;  %vm85_vm2 = vcmask (!%p105_p1), 7168  }
  0x12   :  { %26 = sbr.rel (%p105_p1) target bundleno = 549 (0x225), region = 21  ;;  %33 = vmax.xlane.f32.xlu0 (!%p105_p1), %v27_v1  ;;  %v29_v3 = vld [vmem:[%s183_s2] sm:$0xff] (!%p105_p1)  ;;  %v30_v9 = vld [vmem:[%s183_s2 + $0x8] sm:$0xff] (!%p105_p1) }
  0x13   :  { %vm61_vm0 = vcmp.gt.f32.partialorder (!%p105_p1), %v29_v3, 0.0  ;;  %vm62_vm1 = vcmp.gt.f32.partialorder (!%p105_p1), %v30_v9, 0.0  ;;  %v31_v41 = vld [vmem:[%s184_s3] sm:$0xff] (!%p105_p1)  ;;  %v32_v43 = vld [vmem:[%s184_s3 + $0x8] sm:$0xff] (!%p105_p1) }
  0x14   :  { %v63_v4 = vsel (!%p105_p1), %vm61_vm0, %v29_v3, 1.0  ;;  %v64_v15 = vsel (!%p105_p1), %vm62_vm1, %v30_v9, 1.0 }
  0x15   :  { %109 = vlog2.f32 (!%p105_p1), %v63_v4 }
  0x16   :  { %35 = vmax.xlane.f32.xlu0 (!%p105_p1), %v28_v2 }
  0x1a   :  { %51 = vadd.xlane.f32.xlu0 %v29_v3 }
  0x1f   :  { %v110_v5 = vpop.eup %109 }
  0x20   :  { %v66_v6 = vmul.f32 0.6931472, %v110_v5 }
  0x22   :  { %v69_v10 = vmul.f32 %v66_v6, %v29_v3 }
  0x24   :  { %v71_v16 = vsel %vm61_vm0, %v69_v10, 0.0 }
  0x9f   :  { %v34_v7 = vpop.xlane.xlu0 %33 }
  0xa0   :  { %v37_v8 = vsub.f32 %v27_v1, %v34_v7 }
  0xa2   :  { %v39_v11 = vmul.f32 1.442695, %v37_v8  ;;  %v55_v12 = vmul.f32 %v37_v8, %v29_v3 }
  0xa3   :  { %v36_v13 = vpop.xlane.xlu0 %35 }
  0xa4   :  { %v38_v14 = vsub.f32 %v28_v2, %v36_v13  ;;  %57 = vadd.xlane.f32.xlu0 %v55_v12  ;;  %111 = vpow2.f32 %v39_v11 }
  0xa5   :  { %113 = vlog2.f32 %v64_v15 }
  0xa6   :  { %v41_v17 = vmul.f32 1.442695, %v38_v14  ;;  %v56_v23 = vmul.f32 %v38_v14, %v30_v9 }
  0xa7   :  { %v52_v25 = vpop.xlane.xlu0 %51 }
  0xa8   :  { %115 = vpow2.f32 %v41_v17  ;;  %73 = vadd.xlane.f32.xlu0 %v71_v16 }
  0xae   :  { %v112_v18 = vpop.eup %111 }
  0xaf   :  { %43 = vadd.xlane.f32.xlu1 %v112_v18  ;;  %v114_v19 = vpop.eup %113 }
  0xb0   :  { %v68_v21 = vmul.f32 0.6931472, %v114_v19 }
  0xb2   :  { %v116_v20 = vpop.eup %115  ;;  %v70_v22 = vmul.f32 %v68_v21, %v30_v9 }
  0xb3   :  { %45 = vadd.xlane.f32.xlu1 %v116_v20 }
  0xb4   :  { %v72_v24 = vsel %vm62_vm1, %v70_v22, 0.0 }
  0xb7   :  { %53 = vadd.xlane.f32.xlu1 %v30_v9 }
  0xbb   :  { %59 = vadd.xlane.f32.xlu1 %v56_v23 }
  0xbf   :  { %75 = vadd.xlane.f32.xlu1 %v72_v24 }
 0x131   :  { %v58_v28 = vpop.xlane.xlu0 %57 }
 0x135   :  { %v74_v31 = vpop.xlane.xlu0 %73 }
 0x136   :  { %v77_v34 = vsub.f32 %v74_v31, %v58_v28 }
 0x13c   :  { %v44_v26 = vpop.xlane.xlu1 %43 }
 0x13d   :  { %117 = vlog2.f32 %v44_v26 }
 0x140   :  { %v46_v27 = vpop.xlane.xlu1 %45 }
 0x141   :  { %119 = vlog2.f32 %v46_v27 }
 0x144   :  { %v54_v29 = vpop.xlane.xlu1 %53 }
 0x147   :  { %v118_v30 = vpop.eup %117 }
 0x148   :  { %v48_v32 = vmul.f32 0.6931472, %v118_v30  ;;  %v60_v33 = vpop.xlane.xlu1 %59 }
 0x14a   :  { %v79_v35 = vmul.f32 %v52_v25, %v48_v32 }
 0x14b   :  { %v120_v36 = vpop.eup %119 }
 0x14c   :  { %v50_v37 = vmul.f32 0.6931472, %v120_v36  ;;  %v76_v38 = vpop.xlane.xlu1 %75  ;;  %v81_v39 = vadd.f32 %v79_v35, %v77_v34 }
 0x14d   :  { %v78_v40 = vsub.f32 %v76_v38, %v60_v33 }
 0x14e   :  { %v80_v42 = vmul.f32 %v54_v29, %v50_v37  ;;  %v83_v45 = vmul.f32 %v81_v39, %v31_v41 }
 0x150   :  { %v82_v44 = vadd.f32 %v80_v42, %v78_v40  ;;  %v86_v47 = vsel %vm85_vm2, %v83_v45, 0.0 }
 0x152   :  { %v84_v46 = vmul.f32 %v82_v44, %v32_v43 }
 0x154   :  { %v87_v48 = vsel %vm85_vm2, %v84_v46, 0.0 }
 0x155   :  { %v88_v49 = vadd.f32 %v87_v48, %v86_v47 }
 0x157   :  { %89 = vadd.xlane.f32.xlu0 %v88_v49 }
 0x1e4   :  { %v90_v50 = vpop.xlane.xlu0 %89 }
 0x1e5   :  { %v91_v51 = vrot.slane %v90_v50, 4 }
 0x1e7   :  { %v92_v52 = vadd.f32 %v91_v51, %v90_v50 }
 0x1e9   :  { %v93_v53 = vrot.slane %v92_v52, 2 }
 0x1eb   :  { %v94_v54 = vadd.f32 %v93_v53, %v92_v52 }
 0x1ed   :  { %v95_v55 = vrot.slane %v94_v54, 1 }
 0x1ef   :  { %v96_v56 = vadd.f32 %v95_v55, %v94_v54 }
 0x1f1   :  { %106 = vpush %v96_v56 }
 0x222   :  { %s107_s5 = spop %106 }
 0x223   :  { %v98_v57 = vstv %s107_s5 }
 0x224   :  { %99 = vst [vmem:[%s185_s4] sm:$0xff] %v98_v57 }
 0x225 PF:  {}

</bundles_post_ra>
